<compile_context>
chip_gen: v7x
topology: tpu7x:2x2x1
jax: 0.10.0
libtpu: 0.0.40
codegen_flags: <defaults>
</compile_context>

<pallas_src>
import math

import jax
import jax.numpy as jnp
from jax.experimental import pallas as pl
from jax.experimental.pallas import tpu as pltpu


_LANE = 128          # lane width: output-feature dims padded to multiples of this
_SUBLANE_BF16 = 16   # bf16 sublane tile: batch / K dims padded to multiples of this
_MAX_BATCH_TILE = 512


def _round_up(n, m):
    return ((n + m - 1) // m) * m


def _pad_to(a, shape):
    return jnp.pad(a, [(0, t - s) for s, t in zip(a.shape, shape)])


def _fused_noisy_mlp_kernel(*refs):
    """Fused chain of (x @ W_eff + b_eff -> ReLU) layers, resident in VMEM.

    refs layout (all VMEM):
      refs[0]              x_ref  [TB, D0p]        bf16
      per layer l (2 refs):
        w_eff  [Din_p, Dout_p]  bf16   (noise already fused, pre-transposed [in, out])
        b_eff  [1, Dout_p]      f32
      refs[-1]             o_ref  [TB, DLp]        f32
    """
    n_layers = (len(refs) - 2) // 2
    x_ref, o_ref = refs[0], refs[-1]

    x = x_ref[...]                                              # [TB, D0p] bf16
    for l in range(n_layers):
        w_ref = refs[1 + 2 * l]
        b_ref = refs[2 + 2 * l]
        y = jnp.dot(x, w_ref[...],
                    preferred_element_type=jnp.float32) + b_ref[...]
        x = jnp.maximum(y, 0.0)                                 # ReLU (every layer)
        if l < n_layers - 1:
            x = x.astype(jnp.bfloat16)                          # MXU-native for next dot
    o_ref[...] = x.astype(o_ref.dtype)


def noisy_linear_sequential(params_list, x, *, training=True,
                            max_batch_tile=_MAX_BATCH_TILE):
    """Forward of NoisyLinearSequential via one fused pallas_call.

    params_list: per layer dict with torch-layout f32 tensors
        wmu/wsig [out, in], bmu/bsig [out], eps_in [in], eps_out [out].
    x: [B, in_features] f32.  Returns [B, out_features_last] f32.
    """
    B, d0 = x.shape
    dims = [int(d0)] + [int(p["wmu"].shape[0]) for p in params_list]

    # Lane (output-feature) dims -> multiples of 128; layer-0 K dim only needs
    # the bf16 sublane tile (16).  Inner K dims equal the previous layer's
    # padded lane dim automatically.
    d0_p = _round_up(dims[0], _SUBLANE_BF16)
    dout_p = [_round_up(d, _LANE) for d in dims[1:]]
    din_p = [d0_p] + dout_p[:-1]

    # Batch tiling: one big tile for small batches (single grid step),
    # 512-row tiles for large batches (fills MXU M, shards across v7x TCs).
    bp16 = _round_up(max(B, 1), _SUBLANE_BF16)
    batch_tile = min(bp16, max_batch_tile)
    bp = _round_up(bp16, batch_tile)
    n_tiles = bp // batch_tile

    x_p = _pad_to(x.astype(jnp.bfloat16), (bp, d0_p))

    inputs = [x_p]
    in_specs = [pl.BlockSpec((batch_tile, d0_p), lambda i: (i, 0))]

    for l, p in enumerate(params_list):
        if training:
            # Noise fusion hoisted to the wrapper: done ONCE per noise sample,
            # in f32 (matches the PyTorch module), then cast to bf16 for the MXU.
            w_eps = p["eps_out"][:, None] * p["eps_in"][None, :]       # [out, in]
            w_eff = p["wmu"] + p["wsig"] * w_eps                       # f32 [out, in]
            b_eff = p["bmu"] + p["bsig"] * p["eps_out"]                # f32 [out]
        else:
            w_eff = p["wmu"]
            b_eff = p["bmu"]

        w_eff = _pad_to(w_eff.T.astype(jnp.bfloat16), (din_p[l], dout_p[l]))
        b_eff = _pad_to(b_eff.reshape(1, -1).astype(jnp.float32), (1, dout_p[l]))

        inputs.append(w_eff)
        in_specs.append(pl.BlockSpec(w_eff.shape, lambda i: (0, 0)))
        inputs.append(b_eff)
        in_specs.append(pl.BlockSpec(b_eff.shape, lambda i: (0, 0)))

    out_p = pl.pallas_call(
        _fused_noisy_mlp_kernel,
        out_shape=jax.ShapeDtypeStruct((bp, dout_p[-1]), jnp.float32),
        grid=(n_tiles,),
        in_specs=in_specs,
        out_specs=pl.BlockSpec((batch_tile, dout_p[-1]), lambda i: (i, 0)),
        compiler_params=pltpu.CompilerParams(
            dimension_semantics=("parallel",)),   # batch tiles shard on v7x's 2 TCs
    )(*inputs)

    return out_p[:B, :dims[-1]]


# ----------------------------------------------------------------------------
# Parameter / noise initialization matching NoisyLinear (torch layout, f32).
# ----------------------------------------------------------------------------

def _scale_noise(key, size):
    # PyTorch: x = randn(size); x.sign() * x.abs().sqrt()
    x = jax.random.normal(key, (size,), dtype=jnp.float32)
    return jnp.sign(x) * jnp.sqrt(jnp.abs(x))


def init_noisy_linear(key, in_features, out_features, std_init=0.5):
    k_wmu, k_bmu, k_ein, k_eout = jax.random.split(key, 4)
    mu_range = 1.0 / math.sqrt(in_features)

    weight_mu = jax.random.uniform(
        k_wmu, (out_features, in_features), jnp.float32, -mu_range, mu_range)
    weight_sigma = jnp.full((out_features, in_features),
                            std_init / math.sqrt(in_features), jnp.float32)
    bias_mu = jax.random.uniform(
        k_bmu, (out_features,), jnp.float32, -mu_range, mu_range)
    bias_sigma = jnp.full((out_features,),
                          std_init / math.sqrt(out_features), jnp.float32)

    eps_in = _scale_noise(k_ein, in_features)
    eps_out = _scale_noise(k_eout, out_features)   # bias_epsilon == eps_out

    return dict(wmu=weight_mu, wsig=weight_sigma,
                bmu=bias_mu, bsig=bias_sigma,
                eps_in=eps_in, eps_out=eps_out)


def _reference_forward(params_list, x, *, training=True):
    """Pure-JAX reference mirroring the kernel's numerics (bf16 MXU, f32 accum)."""
    h = x.astype(jnp.bfloat16)
    n = len(params_list)
    for l, p in enumerate(params_list):
        if training:
            w_eff = p["wmu"] + p["wsig"] * (p["eps_out"][:, None] * p["eps_in"][None, :])
            b_eff = p["bmu"] + p["bsig"] * p["eps_out"]
        else:
            w_eff, b_eff = p["wmu"], p["bmu"]
        y = jnp.dot(h, w_eff.T.astype(jnp.bfloat16),
                    preferred_element_type=jnp.float32) + b_eff
        h = jnp.maximum(y, 0.0)
        if l < n - 1:
            h = h.astype(jnp.bfloat16)
    return h


if __name__ == "__main__":
    key = jax.random.PRNGKey(0)
    k_x, k_l0, k_l1, k_l2 = jax.random.split(key, 4)

    # NoisyLinearSequential((32, 64, 0.5), (64, 64, 0.5), (64, 16, 0.5))
    layer_dims = [(32, 64), (64, 64), (64, 16)]
    params_list = [init_noisy_linear(k, fin, fout, std_init=0.5)
                   for k, (fin, fout) in zip((k_l0, k_l1, k_l2), layer_dims)]

    batch = 2
    x = jax.random.normal(k_x, (batch, layer_dims[0][0]), dtype=jnp.float32)

    # Training mode (noisy weights) — the nn.Module default.
    out = jax.block_until_ready(noisy_linear_sequential(params_list, x, training=True))
    ref = _reference_forward(params_list, x, training=True)
    assert out.shape == (batch, layer_dims[-1][1]), out.shape
    assert jnp.allclose(out, ref, atol=1e-3, rtol=1e-3), \
        f"train-mode mismatch, max abs diff={float(jnp.max(jnp.abs(out - ref)))}"

    # Eval mode (mu-only weights) — the deployment path.
    out_e = jax.block_until_ready(noisy_linear_sequential(params_list, x, training=False))
    ref_e = _reference_forward(params_list, x, training=False)
    assert jnp.allclose(out_e, ref_e, atol=1e-3, rtol=1e-3), \
        f"eval-mode mismatch, max abs diff={float(jnp.max(jnp.abs(out_e - ref_e)))}"

    print("KERNEL_OK")
</pallas_src>

<mosaic_0001>
module attributes {stable_mosaic.version = 11 : i64} {
  func.func @_fused_noisy_mlp_kernel(%arg0: i32, %arg1: memref<16x32xbf16, #tpu.memory_space<vmem>>, %arg2: memref<32x128xbf16, #tpu.memory_space<vmem>>, %arg3: memref<1x128xf32, #tpu.memory_space<vmem>>, %arg4: memref<128x128xbf16, #tpu.memory_space<vmem>>, %arg5: memref<1x128xf32, #tpu.memory_space<vmem>>, %arg6: memref<128x128xbf16, #tpu.memory_space<vmem>>, %arg7: memref<1x128xf32, #tpu.memory_space<vmem>>, %arg8: memref<16x128xf32, #tpu.memory_space<vmem>>) attributes {dimension_semantics = [#tpu.dimension_semantics<parallel>], iteration_bounds = array<i64: 1>, scalar_prefetch = 0 : i64, scratch_operands = 0 : i64, tpu.core_type = #tpu.core_type<tc>, window_params = [{transform_indices = @transform_0, window_bounds = array<i64: 16, 32>}, {pipeline_mode = #tpu.pipeline_mode<synchronous>, transform_indices = @transform_1, window_bounds = array<i64: 32, 128>}, {pipeline_mode = #tpu.pipeline_mode<synchronous>, transform_indices = @transform_2, window_bounds = array<i64: 1, 128>}, {pipeline_mode = #tpu.pipeline_mode<synchronous>, transform_indices = @transform_3, window_bounds = array<i64: 128, 128>}, {pipeline_mode = #tpu.pipeline_mode<synchronous>, transform_indices = @transform_4, window_bounds = array<i64: 1, 128>}, {pipeline_mode = #tpu.pipeline_mode<synchronous>, transform_indices = @transform_5, window_bounds = array<i64: 128, 128>}, {pipeline_mode = #tpu.pipeline_mode<synchronous>, transform_indices = @transform_6, window_bounds = array<i64: 1, 128>}, {transform_indices = @transform_7, window_bounds = array<i64: 16, 128>}]} {
    %c0 = arith.constant 0 : index
    %c0_0 = arith.constant 0 : index
    %0 = vector.load %arg1[%c0, %c0_0] : memref<16x32xbf16, #tpu.memory_space<vmem>>, vector<16x32xbf16>
    %c0_1 = arith.constant 0 : index
    %c0_2 = arith.constant 0 : index
    %1 = vector.load %arg2[%c0_1, %c0_2] : memref<32x128xbf16, #tpu.memory_space<vmem>>, vector<32x128xbf16>
    %cst = arith.constant dense<0.000000e+00> : vector<16x128xf32>
    %2 = tpu.matmul %0, %1, %cst {dimension_numbers = #tpu.dot_dimension_numbers<[1], [0], [0], [1], [0, 0, 1, 1], [], []>} : vector<16x32xbf16>, vector<32x128xbf16>, vector<16x128xf32> -> vector<16x128xf32>
    %c0_3 = arith.constant 0 : index
    %c0_4 = arith.constant 0 : index
    %3 = vector.load %arg3[%c0_3, %c0_4] : memref<1x128xf32, #tpu.memory_space<vmem>>, vector<1x128xf32>
    %4 = vector.broadcast %3 : vector<1x128xf32> to vector<16x128xf32>
    %5 = arith.addf %2, %4 : vector<16x128xf32>
    %cst_5 = arith.constant 0.000000e+00 : f32
    %6 = vector.broadcast %cst_5 : f32 to vector<16x128xf32>
    %7 = arith.maximumf %5, %6 : vector<16x128xf32>
    %8 = arith.truncf %7 : vector<16x128xf32> to vector<16x128xbf16>
    %c0_6 = arith.constant 0 : index
    %c0_7 = arith.constant 0 : index
    %9 = vector.load %arg4[%c0_6, %c0_7] : memref<128x128xbf16, #tpu.memory_space<vmem>>, vector<128x128xbf16>
    %cst_8 = arith.constant dense<0.000000e+00> : vector<16x128xf32>
    %10 = tpu.matmul %8, %9, %cst_8 {dimension_numbers = #tpu.dot_dimension_numbers<[1], [0], [0], [1], [0, 0, 1, 1], [], []>} : vector<16x128xbf16>, vector<128x128xbf16>, vector<16x128xf32> -> vector<16x128xf32>
    %c0_9 = arith.constant 0 : index
    %c0_10 = arith.constant 0 : index
    %11 = vector.load %arg5[%c0_9, %c0_10] : memref<1x128xf32, #tpu.memory_space<vmem>>, vector<1x128xf32>
    %12 = vector.broadcast %11 : vector<1x128xf32> to vector<16x128xf32>
    %13 = arith.addf %10, %12 : vector<16x128xf32>
    %cst_11 = arith.constant 0.000000e+00 : f32
    %14 = vector.broadcast %cst_11 : f32 to vector<16x128xf32>
    %15 = arith.maximumf %13, %14 : vector<16x128xf32>
    %16 = arith.truncf %15 : vector<16x128xf32> to vector<16x128xbf16>
    %c0_12 = arith.constant 0 : index
    %c0_13 = arith.constant 0 : index
    %17 = vector.load %arg6[%c0_12, %c0_13] : memref<128x128xbf16, #tpu.memory_space<vmem>>, vector<128x128xbf16>
    %cst_14 = arith.constant dense<0.000000e+00> : vector<16x128xf32>
    %18 = tpu.matmul %16, %17, %cst_14 {dimension_numbers = #tpu.dot_dimension_numbers<[1], [0], [0], [1], [0, 0, 1, 1], [], []>} : vector<16x128xbf16>, vector<128x128xbf16>, vector<16x128xf32> -> vector<16x128xf32>
    %c0_15 = arith.constant 0 : index
    %c0_16 = arith.constant 0 : index
    %19 = vector.load %arg7[%c0_15, %c0_16] : memref<1x128xf32, #tpu.memory_space<vmem>>, vector<1x128xf32>
    %20 = vector.broadcast %19 : vector<1x128xf32> to vector<16x128xf32>
    %21 = arith.addf %18, %20 : vector<16x128xf32>
    %cst_17 = arith.constant 0.000000e+00 : f32
    %22 = vector.broadcast %cst_17 : f32 to vector<16x128xf32>
    %23 = arith.maximumf %21, %22 : vector<16x128xf32>
    %c0_18 = arith.constant 0 : index
    %c0_19 = arith.constant 0 : index
    %24 = vector.load %arg8[%c0_18, %c0_19] : memref<16x128xf32, #tpu.memory_space<vmem>>, vector<16x128xf32>
    tpu.vector_store %arg8[%c0_18, %c0_19], %23 {strides = array<i32>} : memref<16x128xf32, #tpu.memory_space<vmem>>, vector<16x128xf32>,
    return
  }
  func.func @transform_0(%arg0: i32) -> (i32, i32) {
    %c0_i32 = arith.constant 0 : i32
    %c0_i32_0 = arith.constant 0 : i32
    return %arg0, %c0_i32 : i32, i32
  }
  func.func @transform_1(%arg0: i32) -> (i32, i32) {
    %c0_i32 = arith.constant 0 : i32
    %c0_i32_0 = arith.constant 0 : i32
    %c0_i32_1 = arith.constant 0 : i32
    return %c0_i32, %c0_i32_0 : i32, i32
  }
  func.func @transform_2(%arg0: i32) -> (i32, i32) {
    %c0_i32 = arith.constant 0 : i32
    %c0_i32_0 = arith.constant 0 : i32
    %c0_i32_1 = arith.constant 0 : i32
    return %c0_i32, %c0_i32_0 : i32, i32
  }
  func.func @transform_3(%arg0: i32) -> (i32, i32) {
    %c0_i32 = arith.constant 0 : i32
    %c0_i32_0 = arith.constant 0 : i32
    %c0_i32_1 = arith.constant 0 : i32
    return %c0_i32, %c0_i32_0 : i32, i32
  }
  func.func @transform_4(%arg0: i32) -> (i32, i32) {
    %c0_i32 = arith.constant 0 : i32
    %c0_i32_0 = arith.constant 0 : i32
    %c0_i32_1 = arith.constant 0 : i32
    return %c0_i32, %c0_i32_0 : i32, i32
  }
  func.func @transform_5(%arg0: i32) -> (i32, i32) {
    %c0_i32 = arith.constant 0 : i32
    %c0_i32_0 = arith.constant 0 : i32
    %c0_i32_1 = arith.constant 0 : i32
    return %c0_i32, %c0_i32_0 : i32, i32
  }
  func.func @transform_6(%arg0: i32) -> (i32, i32) {
    %c0_i32 = arith.constant 0 : i32
    %c0_i32_0 = arith.constant 0 : i32
    %c0_i32_1 = arith.constant 0 : i32
    return %c0_i32, %c0_i32_0 : i32, i32
  }
  func.func @transform_7(%arg0: i32) -> (i32, i32) {
    %c0_i32 = arith.constant 0 : i32
    %c0_i32_0 = arith.constant 0 : i32
    return %arg0, %c0_i32 : i32, i32
  }
}

</mosaic_0001>

<bundles_post_ra>
// kernel: tpu_custom_call.1
= control target key start
LH: loop header
LB: loop body
LE: loop exit
PB: predicated region body
PF: predicated region fallthrough
CT: control target
= control target key end

     0   :  { %12 = vsyncpa [#allocation3], 0  ;;  %s821_s0 = inlined_call_operand.hbm [shape: bf16[16,32], index: 0, kind: input, shape index: {}]   ;;  %s822_s1 = inlined_call_operand.hbm [shape: bf16[32,128], index: 1, kind: input, shape index: {}]   ;;  %s823_s2 = inlined_call_operand.vmem [shape: f32[1,128], index: 2, kind: input, shape index: {}]   ;;  %s824_s3 = inlined_call_operand.hbm [shape: bf16[128,128], index: 3, kind: input, shape index: {}]   ;;  %s825_s4 = inlined_call_operand.vmem [shape: f32[1,128], index: 4, kind: input, shape index: {}]   ;;  %s826_s5 = inlined_call_operand.hbm [shape: bf16[128,128], index: 5, kind: input, shape index: {}]   ;;  %s827_s6 = inlined_call_operand.vmem [shape: f32[1,128], index: 6, kind: input, shape index: {}]   ;;  %s828_s7 = inlined_call_operand.hbm [shape: f32[16,128], index: 7, kind: output, shape index: {}]  }
   0x1   :  { %13 = vsyncpa [#allocation6], 0 }
   0x2   :  { %14 = vsyncpa [#allocation9], 0 }
   0x3   :  { %15 = vsyncpa [#allocation4], 0  ;;  %s651_s24 = smov [#allocation5]   ;;  %s652_s26 = smov [#allocation2]  }
   0x4   :  { %s33_s25 = sshll.u32 %s651_s24, 4  ;;  %s21_s27 = sshll.u32 %s652_s26, 4  ;;  %s34_s25 = int_to_ptr.vmem [resolvable:$true] %s33_s25  ;;  %s702_s27 = int_to_ptr.vmem [resolvable:$true] %s21_s27 }
   0x5   :  { %s533_s30 = scalar_lea.hbm %s822_s1, 256 }
   0x6   :  { %p534_p0 = scmp.ne.s32.totalorder %s822_s1, %s533_s30  ;;  %p537_p1 = scmp.lt.u32.totalorder %s533_s30, %s822_s1 }
   0x8   :  { %p539_p2 = pnand %p537_p1, %p534_p0 }
   0xa   :  { %542 = shalt.err (!%p539_p2)
}
   0xb   :  { %s543_s12 = scalar_lea.vmem %s34_s25, 256  ;;  %p548_p4 = scmp.lt.s32.totalorder %s34_s25, %s34_s25 }
   0xc   :  { %p544_p3 = scmp.ne.s32.totalorder %s34_s25, %s543_s12  ;;  %p549_p5 = scmp.lt.s32.totalorder %s543_s12, %s543_s12 }
   0xe   :  { %p550_p6 = por %p549_p5, %p548_p4 }
  0x10   :  { %p551_p7 = pnand %p550_p6, %p544_p3 }
  0x12   :  { %554 = shalt.err (!%p551_p7)
}
  0x13   :  { %s653_s13 = smov 64   ;;  %s654_s14 = smov 4  }
  0x14   :  { %39 = dma.hbm_to_vmem [thread:$0]  %s822_s1, 256, %s34_s25, [#allocation6], %s653_s13, %s653_s13, %s654_s14  }
  0x15   :  { %s555_s19 = scalar_lea.hbm %s821_s0, 128 }
  0x16   :  { %p556_p8 = scmp.ne.s32.totalorder %s821_s0, %s555_s19  ;;  %p559_p9 = scmp.lt.u32.totalorder %s555_s19, %s821_s0 }
  0x18   :  { %p561_p10 = pnand %p559_p9, %p556_p8 }
  0x1a   :  { %564 = shalt.err (!%p561_p10)
}
  0x1b   :  { %s565_s24 = scalar_lea.vmem %s702_s27, 128  ;;  %p570_p12 = scmp.lt.s32.totalorder %s702_s27, %s702_s27 }
  0x1c   :  { %p566_p11 = scmp.ne.s32.totalorder %s702_s27, %s565_s24  ;;  %p571_p13 = scmp.lt.s32.totalorder %s565_s24, %s565_s24 }
  0x1e   :  { %p572_p0 = por %p571_p13, %p570_p12 }
  0x20   :  { %p573_p1 = pnand %p572_p0, %p566_p11 }
  0x22   :  { %576 = shalt.err (!%p573_p1)
}
  0x23   :  { %27 = dma.hbm_to_vmem [thread:$0]  %s821_s0, 128, %s702_s27, [#allocation3], %s653_s13, %s653_s13, %s654_s14  }
  0x24   :  { %s655_s26 = smov [#allocation7]   ;;  %s656_s29 = smov [#allocation8]  }
  0x25   :  { %s47_s28 = sshll.u32 %s655_s26, 4  ;;  %s61_s30 = sshll.u32 %s656_s29, 4  ;;  %s48_s28 = int_to_ptr.vmem [resolvable:$true] %s47_s28  ;;  %s739_s30 = int_to_ptr.vmem [resolvable:$true] %s61_s30 }
  0x26   :  { %s577_s10 = scalar_lea.hbm %s824_s3, 1024 }
  0x27   :  { %p578_p2 = scmp.ne.s32.totalorder %s824_s3, %s577_s10  ;;  %p581_p3 = scmp.lt.u32.totalorder %s577_s10, %s824_s3 }
  0x29   :  { %p583_p4 = pnand %p581_p3, %p578_p2 }
  0x2b   :  { %586 = shalt.err (!%p583_p4)
}
  0x2c   :  { %s587_s0 = scalar_lea.vmem %s48_s28, 1024  ;;  %p592_p6 = scmp.lt.s32.totalorder %s48_s28, %s48_s28 }
  0x2d   :  { %p588_p5 = scmp.ne.s32.totalorder %s48_s28, %s587_s0  ;;  %p593_p7 = scmp.lt.s32.totalorder %s587_s0, %s587_s0 }
  0x2f   :  { %p594_p8 = por %p593_p7, %p592_p6 }
  0x31   :  { %p595_p9 = pnand %p594_p8, %p588_p5 }
  0x33   :  { %598 = shalt.err (!%p595_p9)
}
  0x34   :  { %53 = dma.hbm_to_vmem [thread:$0]  %s824_s3, 1024, %s48_s28, [#allocation6], %s653_s13, %s653_s13, %s654_s14  }
  0x35   :  { %s599_s20 = scalar_lea.hbm %s826_s5, 1024 }
  0x36   :  { %p600_p10 = scmp.ne.s32.totalorder %s826_s5, %s599_s20  ;;  %p603_p11 = scmp.lt.u32.totalorder %s599_s20, %s826_s5 }
  0x38   :  { %p605_p12 = pnand %p603_p11, %p600_p10 }
  0x3a   :  { %608 = shalt.err (!%p605_p12)
}
  0x3b   :  { %s609_s1 = scalar_lea.vmem %s739_s30, 1024  ;;  %p614_p0 = scmp.lt.s32.totalorder %s739_s30, %s739_s30 }
  0x3c   :  { %p610_p13 = scmp.ne.s32.totalorder %s739_s30, %s609_s1  ;;  %p615_p1 = scmp.lt.s32.totalorder %s609_s1, %s609_s1 }
  0x3e   :  { %p616_p2 = por %p615_p1, %p614_p0 }
  0x40   :  { %p617_p3 = pnand %p616_p2, %p610_p13 }
  0x42   :  { %620 = shalt.err (!%p617_p3)
}
  0x43   :  { %67 = dma.hbm_to_vmem [thread:$0]  %s826_s5, 1024, %s739_s30, [#allocation9], %s653_s13, %s653_s13, %s654_s14  }
  0x44   :  { %643 = dma.done.wait [#allocation3], 128  }
  0x45   :  { %644 = vsyncadd [#allocation3], 4294967168 }
  0x46   :  { %645 = dma.done.wait [#allocation6], 1280  }
  0x47   :  { %646 = vsyncadd [#allocation6], 4294966016 }
  0x48   :  { %647 = dma.done.wait [#allocation9], 1024  }
  0x49   :  { %648 = vsyncadd [#allocation9], 4294966272  ;;  %v657_v0 = vmov 0.0   ;;  %vm658_vm0 = vmmov 0   ;;  %v514_v1 = vld [vmem:[#allocation5] sm:$0xff]   ;;  %v515_v2 = vld [vmem:[#allocation5 + $0x8] sm:$0xff]  }
  0x4a   :  { %455 = vmatprep.subr.bf16.mxu0 %v657_v0  ;;  %459 = vmatprep.mubr.msk.bf16.mxu0 %vm658_vm0, %v657_v0  ;;  %v517_v3 = vld [vmem:[#allocation7] sm:$0xff]   ;;  %v516_v4 = vld [vmem:[#allocation2] sm:$0xff]   ;;  %vm113_vm1 = vcmask 261120   ;;  %v519_v6 = vld [vmem:[#allocation7 + $0x10] sm:$0xff]   ;;  %s659_s29 = smov [#allocation10]  }
  0x4b   :  { %463 = vmatprep.subr.bf16.mxu1 %v657_v0  ;;  %479 = vmatprep.mubr.msk.bf16.mxu1 %vm658_vm0, %v657_v0  ;;  %v518_v5 = vld [vmem:[#allocation7 + $0x8] sm:$0xff]   ;;  %v520_v7 = vld [vmem:[#allocation7 + $0x18] sm:$0xff]   ;;  %v521_v8 = vld [vmem:[#allocation7 + $0x20] sm:$0xff]   ;;  %s397_s30 = sshll.u32 %s659_s29, 4  ;;  %s398_s30 = int_to_ptr.vmem [resolvable:$true] %s397_s30 }
  0x4c   :  { %456 = vmatpush3.bf16.msra.mxu0 %v514_v1  ;;  %464 = vmatpush3.bf16.msra.mxu1 %v517_v3  ;;  %v522_v9 = vld [vmem:[#allocation7 + $0x28] sm:$0xff]   ;;  %v523_v10 = vld [vmem:[#allocation7 + $0x30] sm:$0xff]   ;;  %v524_v11 = vld [vmem:[#allocation7 + $0x38] sm:$0xff]   ;;  %p626_p5 = scmp.lt.s32.totalorder %s398_s30, %s398_s30 }
  0x4d   :  { %457 = vmatprep.subr.bf16.mxu0 %v657_v0  ;;  %465 = vmatprep.subr.bf16.mxu1 %v657_v0  ;;  %v525_v12 = vld [vmem:[#allocation8] sm:$0xff]   ;;  %v526_v13 = vld [vmem:[#allocation8 + $0x8] sm:$0xff]   ;;  %v527_v14 = vld [vmem:[#allocation8 + $0x10] sm:$0xff]  }
  0x4e   :  { %v528_v15 = vld [vmem:[#allocation8 + $0x18] sm:$0xff]   ;;  %v529_v16 = vld [vmem:[#allocation8 + $0x20] sm:$0xff]   ;;  %v530_v17 = vld [vmem:[#allocation8 + $0x28] sm:$0xff]  }
  0x4f   :  { %v411_v18 = vld [vmem:[%s823_s2] ss:$0 sm:$0xff]  ;;  %v531_v28 = vld [vmem:[#allocation8 + $0x30] sm:$0xff]   ;;  %v532_v29 = vld [vmem:[#allocation8 + $0x38] sm:$0xff]  }
  0x50   :  { %458 = vmatpush3.bf16.msra.mxu0 %v515_v2  ;;  %466 = vmatpush3.bf16.msra.mxu1 %v518_v5  ;;  %v416_v30 = vld [vmem:[%s825_s4] ss:$0 sm:$0xff]  ;;  %s621_s4 = scalar_lea.vmem %s398_s30, 256 }
  0x51   :  { %483 = vmatprep.subr.bf16.mxu0 %v657_v0  ;;  %467 = vmatprep.subr.bf16.mxu1 %v657_v0  ;;  %v425_v40 = vld [vmem:[%s827_s6] ss:$0 sm:$0xff]  ;;  %p622_p4 = scmp.ne.s32.totalorder %s398_s30, %s621_s4  ;;  %p627_p6 = scmp.lt.s32.totalorder %s621_s4, %s621_s4 }
  0x53   :  { %460 = vmatmul.mubr.msk.bf16.vlgmr.msra.gmra.mrb[0].mxu0 %vm113_vm1, %v516_v4  ;;  %p628_p7 = por %p627_p6, %p626_p5 }
  0x54   :  { %499 = vmatprep.mubr.msk.bf16.mxu0 %vm658_vm0, %v657_v0  ;;  %468 = vmatpush3.bf16.msra.mxu1 %v519_v6 }
  0x55   :  { %469 = vmatprep.subr.bf16.mxu1 %v657_v0  ;;  %484 = vmatpush3.bf16.msra.mxu0 %v525_v12  ;;  %p629_p8 = pnand %p628_p7, %p622_p4 }
  0x56   :  { %485 = vmatprep.subr.bf16.mxu0 %v657_v0 }
  0x58   :  { %470 = vmatpush3.bf16.msra.mxu1 %v520_v7 }
  0x59   :  { %471 = vmatprep.subr.bf16.mxu1 %v657_v0  ;;  %486 = vmatpush3.bf16.msra.mxu0 %v526_v13 }
  0x5a   :  { %487 = vmatprep.subr.bf16.mxu0 %v657_v0 }
  0x5c   :  { %472 = vmatpush3.bf16.msra.mxu1 %v521_v8 }
  0x5d   :  { %473 = vmatprep.subr.bf16.mxu1 %v657_v0  ;;  %488 = vmatpush3.bf16.msra.mxu0 %v527_v14 }
  0x5e   :  { %489 = vmatprep.subr.bf16.mxu0 %v657_v0 }
  0x60   :  { %474 = vmatpush3.bf16.msra.mxu1 %v522_v9 }
  0x61   :  { %475 = vmatprep.subr.bf16.mxu1 %v657_v0  ;;  %490 = vmatpush3.bf16.msra.mxu0 %v528_v15 }
  0x62   :  { %491 = vmatprep.subr.bf16.mxu0 %v657_v0 }
  0x64   :  { %476 = vmatpush3.bf16.msra.mxu1 %v523_v10 }
  0x65   :  { %477 = vmatprep.subr.bf16.mxu1 %v657_v0  ;;  %492 = vmatpush3.bf16.msra.mxu0 %v529_v16 }
  0x66   :  { %493 = vmatprep.subr.bf16.mxu0 %v657_v0 }
  0x68   :  { %478 = vmatpush3.bf16.msra.mxu1 %v524_v11 }
  0x69   :  { %494 = vmatpush3.bf16.msra.mxu0 %v530_v17 }
  0x6a   :  { %495 = vmatprep.subr.bf16.mxu0 %v657_v0 }
  0x6d   :  { %496 = vmatpush3.bf16.msra.mxu0 %v531_v28 }
  0x6e   :  { %497 = vmatprep.subr.bf16.mxu0 %v657_v0 }
  0x71   :  { %498 = vmatpush3.bf16.msra.mxu0 %v532_v29 }
 0x126   :  { %v151_v19 = vpop.f32.mrb[0].mxu0 }
 0x127   :  { %v152_v20 = vadd.f32 %v411_v18, %v151_v19  ;;  %v461_v21 = vpop.f32.mrb[1].mxu0 }
 0x128   :  { %v154_v22 = vpop.f32.mrb[2].mxu0 }
 0x129   :  { %v155_v23 = vadd.f32 %v411_v18, %v154_v22  ;;  %v462_v24 = vpop.f32.mrb[3].mxu0  ;;  %v158_v25 = vmax.f32 %v152_v20, 0.0 }
 0x12b   :  { %v159_v26 = vmax.f32 %v155_v23, 0.0 }
 0x12d   :  { %v160_v27 = vpack.c.bf16 %v159_v26, %v158_v25 }
 0x12f   :  { %480 = vmatmul.mubr.bf16.vlgmr.msra.gmra.mrb[0].mxu1 %v160_v27 }
 0x202   :  { %v266_v31 = vpop.f32.mrb[0].mxu1 }
 0x203   :  { %v267_v32 = vadd.f32 %v416_v30, %v266_v31  ;;  %v481_v33 = vpop.f32.mrb[1].mxu1 }
 0x204   :  { %v269_v34 = vpop.f32.mrb[2].mxu1 }
 0x205   :  { %v270_v35 = vadd.f32 %v416_v30, %v269_v34  ;;  %v482_v36 = vpop.f32.mrb[3].mxu1  ;;  %v273_v37 = vmax.f32 %v267_v32, 0.0 }
 0x207   :  { %v274_v38 = vmax.f32 %v270_v35, 0.0 }
 0x209   :  { %v275_v39 = vpack.c.bf16 %v274_v38, %v273_v37 }
 0x20b   :  { %500 = vmatmul.mubr.bf16.vlgmr.msra.gmra.mrb[4].mxu0 %v275_v39 }
 0x2de   :  { %v381_v41 = vpop.f32.mrb[4].mxu0 }
 0x2df   :  { %v382_v42 = vadd.f32 %v425_v40, %v381_v41  ;;  %v501_v43 = vpop.f32.mrb[5].mxu0 }
 0x2e0   :  { %v384_v44 = vpop.f32.mrb[6].mxu0 }
 0x2e1   :  { %v388_v45 = vmax.f32 %v382_v42, 0.0  ;;  %v385_v46 = vadd.f32 %v425_v40, %v384_v44  ;;  %v502_v47 = vpop.f32.mrb[7].mxu0 }
 0x2e3   :  { %390 = vst [vmem:[#allocation10] sm:$0xff] %v388_v45  ;;  %v389_v48 = vmax.f32 %v385_v46, 0.0 }
 0x2e5   :  { %391 = vst [vmem:[#allocation10 + $0x8] sm:$0xff] %v389_v48 }
 0x2e6   :  { %632 = shalt.err (!%p629_p8)
}
 0x2e7   :  { %s633_s9 = scalar_lea.hbm %s828_s7, 256 }
 0x2e8   :  { %p634_p9 = scmp.ne.s32.totalorder %s828_s7, %s633_s9  ;;  %p637_p10 = scmp.lt.u32.totalorder %s633_s9, %s828_s7 }
 0x2ea   :  { %p639_p11 = pnand %p637_p10, %p634_p9 }
 0x2ec   :  { %642 = shalt.err (!%p639_p11)
}
 0x2ed   :  { %s660_s16 = smov 128   ;;  %s661_s0 = smov 8  }
 0x2ee   :  { %403 = dma.vmem_to_hbm [thread:$0]  %s398_s30, 256, %s828_s7, [#allocation4], %s660_s16, %s660_s16, %s661_s0  }
 0x2ef   :  { %649 = dma.done.wait [#allocation4], 256  }
 0x2f0   :  { %650 = vsyncadd [#allocation4], 4294967040 }
 0x2f1   :  { %407 = vsyncpa [#allocation3], 1 }
 0x2f2   :  { %408 = vsyncpa [#allocation6], 1 }
 0x2f3   :  { %409 = vsyncpa [#allocation9], 1 }
 0x2f4   :  { %410 = vsyncpa [#allocation4], 1 }

</bundles_post_ra>
